<compile_context>
chip_gen: v5e
topology: v5e:2x2
jax: 0.10.0
libtpu: 0.0.40
codegen_flags: <defaults>
</compile_context>

<pallas_src>
import functools

import jax
import jax.numpy as jnp
from jax.experimental import pallas as pl
from jax.experimental.pallas import tpu as pltpu

N = 8            # batch rows
H = 32           # hidden width of every Linear
NUM_LINEAR = 4   # Linear layers in the stack (ReLU between consecutive Linears)


def _make_stack_kernel(num_linear):
    """Kernel mirroring the PyTorch SkipConnectionStack loop for the layer list
    [Linear, ReLU] * (num_linear - 1) + [Linear]."""

    def kernel(x_ref, w_ref, b_ref, o_ref):
        # x_ref: (N, H) f32 | w_ref: (L, H, H) bf16, (in, out) | b_ref: (L, 1, H) f32
        skips = []
        h = x_ref[...]                     # f32
        for i in range(num_linear):        # Python-unrolled: i is static
            if len(skips) > 1:             # skip add before this Linear
                h = h + skips[-1]
            skips.append(h)
            h = jnp.dot(h.astype(jnp.bfloat16), w_ref[i],
                        preferred_element_type=jnp.float32) + b_ref[i]
            if i < num_linear - 1:         # ReLU after every Linear but the last
                h = jnp.maximum(h, 0.0)
        o_ref[...] = h

    return kernel


def prepare_params(torch_weights, torch_biases):
    """One-time (init-time) parameter packing.

    torch_weights[i]: (out, in) like nn.Linear.weight; torch_biases[i]: (out,).
    Returns a coalesced (L, H, H) bf16 weight slab laid out (in, out) for the
    kernel's x @ W convention, and an (L, 1, H) f32 bias slab.
    """
    w_slab = jnp.stack([jnp.transpose(w) for w in torch_weights]).astype(jnp.bfloat16)
    b_slab = jnp.stack(torch_biases).astype(jnp.float32)[:, None, :]
    return w_slab, b_slab


@jax.jit
def skip_connection_stack(x, w_slab, b_slab):
    """x: (N, H) f32; w_slab: (L, H, H) bf16; b_slab: (L, 1, H) f32."""
    n, h_in = x.shape
    num_linear, _, h_out = w_slab.shape

    vmem = functools.partial(pl.BlockSpec, memory_space=pltpu.MemorySpace.VMEM)
    cost = pl.CostEstimate(
        flops=2 * n * h_in * h_out * num_linear + 4 * n * h_out * num_linear,
        transcendentals=0,
        bytes_accessed=(x.size * x.dtype.itemsize
                        + w_slab.size * w_slab.dtype.itemsize
                        + b_slab.size * b_slab.dtype.itemsize
                        + n * h_out * 4))

    return pl.pallas_call(
        _make_stack_kernel(num_linear),
        out_shape=jax.ShapeDtypeStruct((n, h_out), jnp.float32),
        in_specs=[vmem(), vmem(), vmem()],   # whole operands resident in VMEM
        out_specs=vmem(),
        cost_estimate=cost,
    )(x, w_slab, b_slab)


def _reference(x, torch_weights, torch_biases):
    """Pure-JAX replica of the PyTorch forward using the same numeric recipe as
    the kernel (bf16 matmul operands, f32 accumulation, f32 elementwise)."""
    skips = []
    h = x.astype(jnp.float32)
    n_lin = len(torch_weights)
    for i in range(n_lin):
        if len(skips) > 1:
            h = h + skips[-1]
        skips.append(h)
        w = jnp.transpose(torch_weights[i]).astype(jnp.bfloat16)
        h = jnp.dot(h.astype(jnp.bfloat16), w,
                    preferred_element_type=jnp.float32) + torch_biases[i].astype(jnp.float32)
        if i < n_lin - 1:
            h = jnp.maximum(h, 0.0)
    return h


if __name__ == "__main__":
    key = jax.random.PRNGKey(0)
    kx, *kws = jax.random.split(key, 1 + 2 * NUM_LINEAR)

    x = jax.random.normal(kx, (N, H), dtype=jnp.float32)

    # Deterministic synthetic nn.Linear(H, H) parameters in native torch layout:
    # weight (out, in), bias (out,).
    weights, biases = [], []
    for i in range(NUM_LINEAR):
        w = jax.random.normal(kws[2 * i], (H, H), dtype=jnp.float32) / jnp.sqrt(float(H))
        b = jax.random.normal(kws[2 * i + 1], (H,), dtype=jnp.float32) * 0.1
        weights.append(w)
        biases.append(b)

    # One-time init: pack params into kernel-ready slabs (never repeated per call).
    w_slab, b_slab = prepare_params(weights, biases)

    out = jax.block_until_ready(skip_connection_stack(x, w_slab, b_slab))
    ref = jax.block_until_ready(_reference(x, weights, biases))

    assert out.shape == (N, H) and out.dtype == jnp.float32
    assert jnp.allclose(out, ref, atol=1e-3, rtol=1e-3), "mismatch vs reference"
    print("KERNEL_OK")
</pallas_src>

<mosaic_0001>
module attributes {stable_mosaic.version = 11 : i64} {
  func.func @kernel(%arg0: memref<8x32xf32, #tpu.memory_space<vmem>>, %arg1: memref<4x32x32xbf16, #tpu.memory_space<vmem>>, %arg2: memref<4x1x32xf32, #tpu.memory_space<vmem>>, %arg3: memref<8x32xf32, #tpu.memory_space<vmem>>) attributes {dimension_semantics = [], scalar_prefetch = 0 : i64, scratch_operands = 0 : i64, tpu.core_type = #tpu.core_type<tc>} {
    %c0 = arith.constant 0 : index
    %c0_0 = arith.constant 0 : index
    %0 = vector.load %arg0[%c0, %c0_0] : memref<8x32xf32, #tpu.memory_space<vmem>>, vector<8x32xf32>
    %1 = arith.truncf %0 : vector<8x32xf32> to vector<8x32xbf16>
    %c0_1 = arith.constant 0 : index
    %c0_2 = arith.constant 0 : index
    %c0_3 = arith.constant 0 : index
    %2 = vector.load %arg1[%c0_1, %c0_2, %c0_3] : memref<4x32x32xbf16, #tpu.memory_space<vmem>>, vector<1x32x32xbf16>
    %3 = vector.shape_cast %2 : vector<1x32x32xbf16> to vector<32x32xbf16>
    %cst = arith.constant dense<0.000000e+00> : vector<8x32xf32>
    %4 = tpu.matmul %1, %3, %cst {dimension_numbers = #tpu.dot_dimension_numbers<[1], [0], [0], [1], [0, 0, 1, 1], [], []>} : vector<8x32xbf16>, vector<32x32xbf16>, vector<8x32xf32> -> vector<8x32xf32>
    %c0_4 = arith.constant 0 : index
    %c0_5 = arith.constant 0 : index
    %c0_6 = arith.constant 0 : index
    %5 = vector.load %arg2[%c0_4, %c0_5, %c0_6] : memref<4x1x32xf32, #tpu.memory_space<vmem>>, vector<1x1x32xf32>
    %6 = vector.shape_cast %5 : vector<1x1x32xf32> to vector<1x32xf32>
    %7 = vector.broadcast %6 : vector<1x32xf32> to vector<8x32xf32>
    %8 = arith.addf %4, %7 : vector<8x32xf32>
    %cst_7 = arith.constant 0.000000e+00 : f32
    %9 = vector.broadcast %cst_7 : f32 to vector<8x32xf32>
    %10 = arith.maximumf %8, %9 : vector<8x32xf32>
    %11 = arith.truncf %10 : vector<8x32xf32> to vector<8x32xbf16>
    %c1 = arith.constant 1 : index
    %c0_8 = arith.constant 0 : index
    %c0_9 = arith.constant 0 : index
    %12 = vector.load %arg1[%c1, %c0_8, %c0_9] : memref<4x32x32xbf16, #tpu.memory_space<vmem>>, vector<1x32x32xbf16>
    %13 = vector.shape_cast %12 : vector<1x32x32xbf16> to vector<32x32xbf16>
    %cst_10 = arith.constant dense<0.000000e+00> : vector<8x32xf32>
    %14 = tpu.matmul %11, %13, %cst_10 {dimension_numbers = #tpu.dot_dimension_numbers<[1], [0], [0], [1], [0, 0, 1, 1], [], []>} : vector<8x32xbf16>, vector<32x32xbf16>, vector<8x32xf32> -> vector<8x32xf32>
    %c1_11 = arith.constant 1 : index
    %c0_12 = arith.constant 0 : index
    %c0_13 = arith.constant 0 : index
    %15 = vector.load %arg2[%c1_11, %c0_12, %c0_13] : memref<4x1x32xf32, #tpu.memory_space<vmem>>, vector<1x1x32xf32>
    %16 = vector.shape_cast %15 : vector<1x1x32xf32> to vector<1x32xf32>
    %17 = vector.broadcast %16 : vector<1x32xf32> to vector<8x32xf32>
    %18 = arith.addf %14, %17 : vector<8x32xf32>
    %cst_14 = arith.constant 0.000000e+00 : f32
    %19 = vector.broadcast %cst_14 : f32 to vector<8x32xf32>
    %20 = arith.maximumf %18, %19 : vector<8x32xf32>
    %21 = arith.addf %20, %10 : vector<8x32xf32>
    %22 = arith.truncf %21 : vector<8x32xf32> to vector<8x32xbf16>
    %c2 = arith.constant 2 : index
    %c0_15 = arith.constant 0 : index
    %c0_16 = arith.constant 0 : index
    %23 = vector.load %arg1[%c2, %c0_15, %c0_16] : memref<4x32x32xbf16, #tpu.memory_space<vmem>>, vector<1x32x32xbf16>
    %24 = vector.shape_cast %23 : vector<1x32x32xbf16> to vector<32x32xbf16>
    %cst_17 = arith.constant dense<0.000000e+00> : vector<8x32xf32>
    %25 = tpu.matmul %22, %24, %cst_17 {dimension_numbers = #tpu.dot_dimension_numbers<[1], [0], [0], [1], [0, 0, 1, 1], [], []>} : vector<8x32xbf16>, vector<32x32xbf16>, vector<8x32xf32> -> vector<8x32xf32>
    %c2_18 = arith.constant 2 : index
    %c0_19 = arith.constant 0 : index
    %c0_20 = arith.constant 0 : index
    %26 = vector.load %arg2[%c2_18, %c0_19, %c0_20] : memref<4x1x32xf32, #tpu.memory_space<vmem>>, vector<1x1x32xf32>
    %27 = vector.shape_cast %26 : vector<1x1x32xf32> to vector<1x32xf32>
    %28 = vector.broadcast %27 : vector<1x32xf32> to vector<8x32xf32>
    %29 = arith.addf %25, %28 : vector<8x32xf32>
    %cst_21 = arith.constant 0.000000e+00 : f32
    %30 = vector.broadcast %cst_21 : f32 to vector<8x32xf32>
    %31 = arith.maximumf %29, %30 : vector<8x32xf32>
    %32 = arith.addf %31, %21 : vector<8x32xf32>
    %33 = arith.truncf %32 : vector<8x32xf32> to vector<8x32xbf16>
    %c3 = arith.constant 3 : index
    %c0_22 = arith.constant 0 : index
    %c0_23 = arith.constant 0 : index
    %34 = vector.load %arg1[%c3, %c0_22, %c0_23] : memref<4x32x32xbf16, #tpu.memory_space<vmem>>, vector<1x32x32xbf16>
    %35 = vector.shape_cast %34 : vector<1x32x32xbf16> to vector<32x32xbf16>
    %cst_24 = arith.constant dense<0.000000e+00> : vector<8x32xf32>
    %36 = tpu.matmul %33, %35, %cst_24 {dimension_numbers = #tpu.dot_dimension_numbers<[1], [0], [0], [1], [0, 0, 1, 1], [], []>} : vector<8x32xbf16>, vector<32x32xbf16>, vector<8x32xf32> -> vector<8x32xf32>
    %c3_25 = arith.constant 3 : index
    %c0_26 = arith.constant 0 : index
    %c0_27 = arith.constant 0 : index
    %37 = vector.load %arg2[%c3_25, %c0_26, %c0_27] : memref<4x1x32xf32, #tpu.memory_space<vmem>>, vector<1x1x32xf32>
    %38 = vector.shape_cast %37 : vector<1x1x32xf32> to vector<1x32xf32>
    %39 = vector.broadcast %38 : vector<1x32xf32> to vector<8x32xf32>
    %40 = arith.addf %36, %39 : vector<8x32xf32>
    %c0_28 = arith.constant 0 : index
    %c0_29 = arith.constant 0 : index
    %41 = vector.load %arg3[%c0_28, %c0_29] : memref<8x32xf32, #tpu.memory_space<vmem>>, vector<8x32xf32>
    tpu.vector_store %arg3[%c0_28, %c0_29], %40 {strides = array<i32>} : memref<8x32xf32, #tpu.memory_space<vmem>>, vector<8x32xf32>,
    return
  }
}

</mosaic_0001>

<bundles_post_ra>
// kernel: skip_connection_stack.1
= control target key start
LH: loop header
LB: loop body
LE: loop exit
PB: predicated region body
PF: predicated region fallthrough
CT: control target
= control target key end

     0   :  { %8 = vsyncpa [#allocation3], 0  ;;  %s444_s0 = inlined_call_operand.hbm [shape: f32[8,32], index: 0, kind: input, shape index: {}]   ;;  %s445_s1 = inlined_call_operand.hbm [shape: bf16[4,32,32], index: 1, kind: input, shape index: {}]   ;;  %s446_s2 = inlined_call_operand.hbm [shape: f32[4,1,32], index: 2, kind: input, shape index: {}]   ;;  %s447_s3 = inlined_call_operand.hbm [shape: f32[8,32], index: 3, kind: output, shape index: {}]  }
   0x1   :  { %9 = vsyncpa [#allocation6], 0  ;;  %s26_s14 = sshll.u32 %s445_s1, 4  ;;  %s27_s14 = int_to_ptr.hbm [resolvable:$true] %s26_s14 }
   0x2   :  { %10 = vsyncpa [#allocation4], 0  ;;  %s399_s15 = smov [#allocation5]   ;;  %s16_s19 = sshll.u32 %s444_s0, 4  ;;  %s17_s19 = int_to_ptr.hbm [resolvable:$true] %s16_s19 }
   0x3   :  { %s28_s16 = sshll.u32 %s399_s15, 4  ;;  %s400_s20 = smov 64   ;;  %s29_s16 = int_to_ptr.vmem [resolvable:$true] %s28_s16 }
   0x4   :  { %s401_s21 = smov 4   ;;  %s402_s22 = smov [#allocation2]  }
   0x5   :  { %34 = dma.hbm_to_vmem [thread:$0]  %s27_s14, 1024, %s29_s16, [#allocation6], %s400_s20, %s400_s20, %s401_s21  }
   0x6   :  { %s18_s23 = sshll.u32 %s402_s22, 4  ;;  %s39_s26 = sshll.u32 %s446_s2, 4  ;;  %s19_s23 = int_to_ptr.vmem [resolvable:$true] %s18_s23  ;;  %s40_s26 = int_to_ptr.hbm [resolvable:$true] %s39_s26 }
   0x7   :  { %21 = dma.hbm_to_vmem [thread:$0]  %s17_s19, 128, %s19_s23, [#allocation3]  }
   0x8   :  { %s403_s1 = smov [#allocation7]   ;;  %s404_s28 = smov 16  }
   0x9   :  { %s41_s27 = sshll.u32 %s403_s1, 4  ;;  %s405_s29 = smov 1   ;;  %s42_s27 = int_to_ptr.vmem [resolvable:$true] %s41_s27 }
   0xa   :  { %47 = dma.hbm_to_vmem [thread:$0]  %s40_s26, 64, %s42_s27, [#allocation6], %s404_s28, %s404_s28, %s405_s29  }
   0xb   :  { %393 = dma.done.wait [#allocation3], 128  }
   0xc   :  { %394 = vsyncadd [#allocation3], 4294967168 }
   0xd   :  { %395 = dma.done.wait [#allocation6], 1088  }
   0xe   :  { %396 = vsyncadd [#allocation6], 4294966208  ;;  %v278_v0 = vld [vmem:[#allocation5 + $0x8] sm:$0xff]  ;;  %v277_v1 = vld [vmem:[#allocation5] sm:$0xff]  ;;  %vm83_vm0 = vcmask 261120   ;;  %s406_s0 = smov [#allocation8]  }
   0xf   :  { %93 = vmatpush.bf16.msra.mxu0 %v278_v0  ;;  %v61_v2 = vld [vmem:[#allocation2] sm:$0xff]  ;;  %v279_v5 = vld [vmem:[#allocation5 + $0x10] sm:$0xff]  ;;  %v293_v6 = vld [vmem:[#allocation7] ss:$0 sm:$0xff]  ;;  %s228_s2 = sshll.u32 %s406_s0, 4  ;;  %s230_s5 = sshll.u32 %s447_s3, 4  ;;  %s229_s2 = int_to_ptr.vmem [resolvable:$true] %s228_s2  ;;  %s231_s5 = int_to_ptr.hbm [resolvable:$true] %s230_s5 }
  0x10   :  { %v62_v3 = vpack.c.bf16 %v61_v2, %v61_v2  ;;  %v280_v4 = vld [vmem:[#allocation5 + $0x18] sm:$0xff]  ;;  %v282_v12 = vld [vmem:[#allocation5 + $0x28] sm:$0xff]  ;;  %v281_v13 = vld [vmem:[#allocation5 + $0x20] sm:$0xff] }
  0x11   :  { %133 = vmatpush.bf16.msra.mxu1 %v280_v4  ;;  %174 = vmatpush.bf16.msra.mxu2 %v282_v12  ;;  %v294_v14 = vld [vmem:[#allocation7 + $0x1] ss:$0 sm:$0xff]  ;;  %v284_v21 = vld [vmem:[#allocation5 + $0x38] sm:$0xff]  ;;  %v283_v22 = vld [vmem:[#allocation5 + $0x30] sm:$0xff] }
  0x12   :  { %215 = vmatpush.bf16.msra.mxu3 %v284_v21  ;;  %v295_v23 = vld [vmem:[#allocation7 + $0x2] ss:$0 sm:$0xff]  ;;  %v296_v30 = vld [vmem:[#allocation7 + $0x3] ss:$0 sm:$0xff] }
  0x13   :  { %94 = vmatpush.bf16.msra.mxu0 %v277_v1 }
  0x15   :  { %134 = vmatpush.bf16.msra.mxu1 %v279_v5  ;;  %175 = vmatpush.bf16.msra.mxu2 %v281_v13 }
  0x16   :  { %249 = vmatmul.msk.bf16.vlgmr.msra.gmra.mxu0 %vm83_vm0, %v62_v3  ;;  %216 = vmatpush.bf16.msra.mxu3 %v283_v22 }
  0x93   :  { %v96_v7 = vpop.f32.mrf.mxu0 }
  0x94   :  { %v97_v8 = vadd.f32 %v293_v6, %v96_v7 }
  0x96   :  { %v100_v9 = vmax.f32 %v97_v8, 0.0 }
  0x98   :  { %v101_v10 = vpack.c.bf16 %v100_v9, %v100_v9 }
  0x9a   :  { %258 = vmatmul.msk.bf16.vlgmr.msra.gmra.mxu1 %vm83_vm0, %v101_v10 }
  0x9b   :  { %v98_v11 = vpop.f32.mrf.mxu0 }
 0x117   :  { %v136_v15 = vpop.f32.mrf.mxu1 }
 0x118   :  { %v137_v16 = vadd.f32 %v294_v14, %v136_v15 }
 0x11a   :  { %v140_v17 = vmax.f32 %v137_v16, 0.0 }
 0x11c   :  { %v141_v18 = vadd.f32 %v140_v17, %v100_v9 }
 0x11e   :  { %v142_v19 = vpack.c.bf16 %v141_v18, %v141_v18 }
 0x11f   :  { %v138_v20 = vpop.f32.mrf.mxu1 }
 0x120   :  { %267 = vmatmul.msk.bf16.vlgmr.msra.gmra.mxu2 %vm83_vm0, %v142_v19 }
 0x1a3   :  { %v177_v24 = vpop.f32.mrf.mxu2 }
 0x1a4   :  { %v178_v25 = vadd.f32 %v295_v23, %v177_v24 }
 0x1a6   :  { %v181_v26 = vmax.f32 %v178_v25, 0.0 }
 0x1a8   :  { %v182_v27 = vadd.f32 %v181_v26, %v141_v18 }
 0x1aa   :  { %v183_v28 = vpack.c.bf16 %v182_v27, %v182_v27 }
 0x1ab   :  { %v179_v29 = vpop.f32.mrf.mxu2 }
 0x1ac   :  { %276 = vmatmul.msk.bf16.vlgmr.msra.gmra.mxu3 %vm83_vm0, %v183_v28 }
 0x22f   :  { %v218_v31 = vpop.f32.mrf.mxu3 }
 0x230   :  { %v219_v32 = vadd.f32 %v296_v30, %v218_v31 }
 0x232   :  { %222 = vst.msk [vmem:[#allocation8] sm:$0xff] %vm83_vm0, %v219_v32 }
 0x233   :  { %233 = dma.vmem_to_hbm [thread:$0]  %s229_s2, 128, %s231_s5, [#allocation4]  }
 0x237   :  { %v220_v33 = vpop.f32.mrf.mxu3 }
 0x238   :  { %397 = dma.done.wait [#allocation4], 128  }
 0x239   :  { %398 = vsyncadd [#allocation4], 4294967168 }
 0x23a   :  { %238 = vsyncpa [#allocation3], 1 }
 0x23b   :  { %239 = vsyncpa [#allocation6], 1 }
 0x23c   :  { %240 = vsyncpa [#allocation4], 1 }

</bundles_post_ra>
